<compile_context>
chip_gen: v6e
topology: v6e:2x2x1
jax: 0.10.0
libtpu: 0.0.40
codegen_flags: <defaults>
</compile_context>

<pallas_src>
import functools

import jax
import jax.numpy as jnp
import numpy as np
from jax.experimental import pallas as pl
from jax.experimental.pallas import tpu as pltpu

LANE = 128


# --------------------------------------------------------------------------------------
# helpers
# --------------------------------------------------------------------------------------
def _round_up(x, m):
    return ((x + m - 1) // m) * m


def _pad_to(x, shape):
    return jnp.pad(x, [(0, t - s) for s, t in zip(x.shape, shape)])


@functools.lru_cache(maxsize=1)
def _vmem_budget():
    """Generation-aware scoped-VMEM budget (~96 MiB on v5e/v6e, ~48 MiB on v7x)."""
    cap = 64 * 1024 * 1024
    try:
        cap = int(getattr(pltpu.get_tpu_info(), "vmem_capacity_bytes", cap))
    except Exception:
        pass
    return min(int(cap * 3 // 4), 100 * 1024 * 1024)


def _pick_divisor_tile(n_pad, candidates):
    for t in candidates:
        if t <= n_pad and n_pad % t == 0:
            return t
    return LANE


def _plan(n_pad, h_pad, c2_pad, budget):
    """Choose the propagation schedule.

    "resident": Z (and the fused W2) stay fully resident in VMEM; the grid streams only
                row stripes of A_hat, so A is read exactly once per pass and Z never
                re-fetched.
    "tiled"   : fallback (i, k) accumulator schedule for graphs whose resident-Z /
                A row-stripe footprint exceeds the per-generation VMEM budget.
    """
    f_max = max(h_pad, c2_pad)
    for tm in (512, 256, 128):
        if n_pad % tm:
            continue
        a_stripe = 2 * tm * n_pad * 2          # double-buffered bf16 A row stripe
        z_res = 2 * n_pad * f_max * 2          # resident Z (x2: conservative)
        out_t = 2 * tm * c2_pad * 4            # double-buffered f32 output tile
        misc = tm * f_max * 4 + h_pad * c2_pad * 2 + 8 * f_max * 4
        if a_stripe + z_res + out_t + misc <= budget:
            return "resident", tm, n_pad
    tm = _pick_divisor_tile(n_pad, (512, 256, 128))
    tk = _pick_divisor_tile(n_pad, (1024, 512, 256, 128))
    return "tiled", tm, tk


# --------------------------------------------------------------------------------------
# kernels
# --------------------------------------------------------------------------------------
def _xw_kernel(x_ref, w_ref, o_ref):
    """One row tile of the dense feature transform Z = X @ W (MXU, f32 accumulation)."""
    o_ref[...] = jnp.dot(x_ref[...], w_ref[...],
                         preferred_element_type=jnp.float32).astype(o_ref.dtype)


def _prop_resident_kernel(*refs, apply_relu, fuse_w2):
    """out_tile = act(A_row_stripe @ Z + b) [@ W2]; Z / b / W2 are VMEM-resident."""
    if fuse_w2:
        a_ref, z_ref, b_ref, w2_ref, o_ref = refs
    else:
        a_ref, z_ref, b_ref, o_ref = refs
    r = jnp.dot(a_ref[...], z_ref[...], preferred_element_type=jnp.float32) + b_ref[...]
    if apply_relu:
        r = jnp.maximum(r, 0.0)
    if fuse_w2:
        r = jnp.dot(r.astype(w2_ref.dtype), w2_ref[...],
                    preferred_element_type=jnp.float32)
    o_ref[...] = r.astype(o_ref.dtype)


def _prop_tiled_kernel(*refs, apply_relu, fuse_w2):
    """(i, k) accumulator schedule: acc += A_ik @ Z_k; bias/ReLU/W2 at the last k."""
    if fuse_w2:
        a_ref, z_ref, b_ref, w2_ref, o_ref, acc_ref = refs
    else:
        a_ref, z_ref, b_ref, o_ref, acc_ref = refs
    k = pl.program_id(1)

    @pl.when(k == 0)
    def _init():
        acc_ref[...] = jnp.zeros_like(acc_ref)

    acc_ref[...] += jnp.dot(a_ref[...], z_ref[...], preferred_element_type=jnp.float32)

    @pl.when(k == pl.num_programs(1) - 1)
    def _finalize():
        r = acc_ref[...] + b_ref[...]
        if apply_relu:
            r = jnp.maximum(r, 0.0)
        if fuse_w2:
            r = jnp.dot(r.astype(w2_ref.dtype), w2_ref[...],
                        preferred_element_type=jnp.float32)
        o_ref[...] = r.astype(o_ref.dtype)


# --------------------------------------------------------------------------------------
# pallas_call wrappers
# --------------------------------------------------------------------------------------
def _feature_transform(x, w, *, tm, out_dtype, vmem_limit):
    """Z = X @ W, row-tiled with large tiles.  x: (N_pad, Cin_pad) bf16, w: (Cin_pad, F) bf16."""
    n_pad, cin = x.shape
    f = w.shape[1]
    return pl.pallas_call(
        _xw_kernel,
        out_shape=jax.ShapeDtypeStruct((n_pad, f), out_dtype),
        grid_spec=pltpu.PrefetchScalarGridSpec(
            num_scalar_prefetch=0,
            grid=(n_pad // tm,),
            in_specs=[pl.BlockSpec((tm, cin), lambda i: (i, 0)),
                      pl.BlockSpec((cin, f), lambda i: (0, 0))],
            out_specs=pl.BlockSpec((tm, f), lambda i: (i, 0))),
        compiler_params=pltpu.CompilerParams(
            dimension_semantics=("parallel",),
            vmem_limit_bytes=vmem_limit),
    )(x, w)


def _propagate(a, z, b, w2, *, apply_relu, out_dtype, mode, tm, tk, vmem_limit):
    """OUT = act(A_hat @ Z + b) [@ W2], streamed over row stripes of A_hat."""
    n_rows, k_pad = a.shape
    f_in = z.shape[1]
    fuse_w2 = w2 is not None
    f_out = w2.shape[1] if fuse_w2 else f_in
    operands = (a, z, b) + ((w2,) if fuse_w2 else ())

    if mode == "resident":
        grid = (n_rows // tm,)
        in_specs = [pl.BlockSpec((tm, k_pad), lambda i: (i, 0)),
                    pl.BlockSpec((k_pad, f_in), lambda i: (0, 0)),   # resident Z
                    pl.BlockSpec((1, f_in), lambda i: (0, 0))]
        if fuse_w2:
            in_specs.append(pl.BlockSpec((f_in, f_out), lambda i: (0, 0)))
        out_specs = pl.BlockSpec((tm, f_out), lambda i: (i, 0))
        scratch = []
        kernel = functools.partial(_prop_resident_kernel,
                                   apply_relu=apply_relu, fuse_w2=fuse_w2)
        dims = ("parallel",)
    else:
        grid = (n_rows // tm, k_pad // tk)
        in_specs = [pl.BlockSpec((tm, tk), lambda i, k: (i, k)),
                    pl.BlockSpec((tk, f_in), lambda i, k: (k, 0)),
                    pl.BlockSpec((1, f_in), lambda i, k: (0, 0))]
        if fuse_w2:
            in_specs.append(pl.BlockSpec((f_in, f_out), lambda i, k: (0, 0)))
        out_specs = pl.BlockSpec((tm, f_out), lambda i, k: (i, 0))
        scratch = [pltpu.VMEM((tm, f_in), jnp.float32)]
        kernel = functools.partial(_prop_tiled_kernel,
                                   apply_relu=apply_relu, fuse_w2=fuse_w2)
        dims = ("parallel", "arbitrary")

    return pl.pallas_call(
        kernel,
        out_shape=jax.ShapeDtypeStruct((n_rows, f_out), out_dtype),
        grid_spec=pltpu.PrefetchScalarGridSpec(
            num_scalar_prefetch=0, grid=grid, in_specs=in_specs,
            out_specs=out_specs, scratch_shapes=scratch),
        compiler_params=pltpu.CompilerParams(
            dimension_semantics=dims, vmem_limit_bytes=vmem_limit),
    )(*operands)


# --------------------------------------------------------------------------------------
# model
# --------------------------------------------------------------------------------------
def gcn_normalized_adjacency(edge_index, num_nodes):
    """Dense A_hat = D^{-1/2} (A^T + I) D^{-1/2}, matching PyG GCNConv gcn_norm
    (flow='source_to_target', add_self_loops=True)."""
    src = edge_index[0]
    dst = edge_index[1]
    a = jnp.zeros((num_nodes, num_nodes), jnp.float32)
    a = a.at[dst, src].add(1.0)                       # edge j -> i
    a = a + jnp.eye(num_nodes, dtype=jnp.float32)     # self loops
    deg = jnp.sum(a, axis=1)
    dinv = jnp.where(deg > 0, jax.lax.rsqrt(deg), 0.0)
    return dinv[:, None] * a * dinv[None, :]


def build_padded_adjacency(edge_index, num_nodes):
    """Build A_hat ONCE, already padded to (n_pad, n_pad) and cast to bf16, so the
    per-forward jit never re-materializes / re-casts the dominant NxN operand.
    Returns (a_pad_bf16, a_hat_f32) - the f32 copy is only for the reference check."""
    n_pad = _round_up(max(num_nodes, 1), LANE)
    a_hat = gcn_normalized_adjacency(edge_index, num_nodes)
    a_pad = _pad_to(a_hat, (n_pad, n_pad)).astype(jnp.bfloat16)
    return a_pad, a_hat


@functools.partial(jax.jit, static_argnames=("force_mode",))
def vgae_encoder_forward(x, a_pad, params, force_mode=None):
    n, cin = x.shape
    n_pad = a_pad.shape[0]
    hidden = params["w1"].shape[1]
    out_c = params["wmu"].shape[1]

    cin_pad = _round_up(cin, LANE)
    h_pad = _round_up(hidden, LANE)
    c2_pad = _round_up(2 * out_c, LANE)

    budget = _vmem_budget()
    mode, tm, tk = _plan(n_pad, h_pad, c2_pad, budget)
    if force_mode is not None:
        mode = force_mode
        if mode == "tiled":
            tm = _pick_divisor_tile(n_pad, (512, 256, 128))
            tk = _pick_divisor_tile(n_pad, (1024, 512, 256, 128))

    # pad + cast the small per-layer operands (cheap; A_hat is already padded bf16).
    x_bf = _pad_to(x, (n_pad, cin_pad)).astype(jnp.bfloat16)
    w1 = _pad_to(params["w1"], (cin_pad, h_pad)).astype(jnp.bfloat16)
    b1 = _pad_to(params["b1"], (1, h_pad)).astype(jnp.float32)
    # Fuse conv_mu / conv_logstd into one lane-dense weight -> one A_hat pass instead of two.
    wcat = _pad_to(jnp.concatenate([params["wmu"], params["wls"]], axis=1),
                   (h_pad, c2_pad)).astype(jnp.bfloat16)
    bcat = _pad_to(jnp.concatenate([params["bmu"], params["bls"]], axis=1),
                   (1, c2_pad)).astype(jnp.float32)

    # layer-1 feature transform: Z1 = X @ W1 (large row tiles; near-zero grid overhead)
    tm_feat = _pick_divisor_tile(n_pad, (1024, 512, 256, 128))
    z1 = _feature_transform(x_bf, w1, tm=tm_feat, out_dtype=jnp.bfloat16,
                            vmem_limit=budget)

    # layer-1 propagation FUSED with the layer-2/3 feature transform:
    #   Z2 = relu(A_hat @ Z1 + b1) @ [Wmu | Wls]
    # (no H round-trip through HBM; dropout p=0.3 is the eval-mode identity)
    # TODO(synk): a training-mode dropout would mask H here via pltpu.prng_seed /
    #             pltpu.prng_random_bits before the @ wcat.
    z2 = _propagate(a_pad, z1, b1, wcat, apply_relu=True, out_dtype=jnp.bfloat16,
                    mode=mode, tm=tm, tk=tk, vmem_limit=budget)

    # layers 2+3 fused: [mu | logstd] = A_hat @ Z2 + [bmu | bls]
    out = _propagate(a_pad, z2, bcat, None, apply_relu=False, out_dtype=jnp.float32,
                     mode=mode, tm=tm, tk=tk, vmem_limit=budget)

    mu = out[:n, :out_c]
    logstd = out[:n, out_c:2 * out_c]
    return mu, logstd


def init_params(key, in_channels, out_channels):
    """Deterministic synthetic parameters (glorot-style scale, biases zero)."""
    k1, k2, k3 = jax.random.split(key, 3)
    hidden = 2 * out_channels

    def glorot(k, shape):
        fan_in, fan_out = shape
        lim = jnp.sqrt(6.0 / (fan_in + fan_out))
        return jax.random.uniform(k, shape, jnp.float32, -lim, lim)

    return {
        "w1": glorot(k1, (in_channels, hidden)),
        "b1": jnp.zeros((1, hidden), jnp.float32),
        "wmu": glorot(k2, (hidden, out_channels)),
        "bmu": jnp.zeros((1, out_channels), jnp.float32),
        "wls": glorot(k3, (hidden, out_channels)),
        "bls": jnp.zeros((1, out_channels), jnp.float32),
    }


def _reference_forward(x, a_hat, p):
    h = jnp.maximum(a_hat @ (x @ p["w1"]) + p["b1"], 0.0)
    mu = a_hat @ (h @ p["wmu"]) + p["bmu"]
    ls = a_hat @ (h @ p["wls"]) + p["bls"]
    return mu, ls


def _ring_edge_index(num_nodes):
    src = np.arange(num_nodes)
    dst = (src + 1) % num_nodes
    return jnp.asarray(
        np.stack([np.concatenate([src, dst]), np.concatenate([dst, src])]),
        dtype=jnp.int32)


def _run_case(key, num_nodes, in_channels, out_channels, force_mode=None,
              rtol=5e-2, atol=5e-2):
    kx, kp = jax.random.split(key)
    x = jax.random.normal(kx, (num_nodes, in_channels), jnp.float32)
    # A_hat is padded/cast once, outside the jit, and reused across forward calls.
    a_pad, a_hat = build_padded_adjacency(_ring_edge_index(num_nodes), num_nodes)
    params = init_params(kp, in_channels, out_channels)

    mu, logstd = vgae_encoder_forward(x, a_pad, params, force_mode=force_mode)
    jax.block_until_ready((mu, logstd))

    mu_ref, ls_ref = _reference_forward(x, a_hat, params)
    assert mu.shape == (num_nodes, out_channels) and logstd.shape == (num_nodes, out_channels)
    # bf16 MXU operands (f32 accumulation) -> loosened tolerance vs the f32 reference.
    assert np.allclose(np.asarray(mu), np.asarray(mu_ref), rtol=rtol, atol=atol)
    assert np.allclose(np.asarray(logstd), np.asarray(ls_ref), rtol=rtol, atol=atol)


if __name__ == "__main__":
    key = jax.random.PRNGKey(0)
    k_small, k_res, k_tiled = jax.random.split(key, 3)

    # small case (single row stripe, resident-Z path)
    _run_case(k_small, num_nodes=16, in_channels=8, out_channels=4)
    # larger case: multi row-stripe resident-Z path, padding 520 -> 640 (not 1024)
    _run_case(k_res, num_nodes=520, in_channels=8, out_channels=4)
    # explicitly exercise the tiled (i, k) accumulator fallback for correctness coverage
    _run_case(k_tiled, num_nodes=520, in_channels=8, out_channels=4, force_mode="tiled")

    print("KERNEL_OK")
</pallas_src>

<mosaic_0001>
module attributes {stable_mosaic.version = 11 : i64} {
  func.func @_xw_kernel(%arg0: i32, %arg1: memref<128x128xbf16, #tpu.memory_space<vmem>>, %arg2: memref<128x128xbf16, #tpu.memory_space<vmem>>, %arg3: memref<128x128xbf16, #tpu.memory_space<vmem>>) attributes {dimension_semantics = [#tpu.dimension_semantics<parallel>], iteration_bounds = array<i64: 1>, scalar_prefetch = 0 : i64, scratch_operands = 0 : i64, tpu.core_type = #tpu.core_type<tc>, window_params = [{transform_indices = @transform_0, window_bounds = array<i64: 128, 128>}, {pipeline_mode = #tpu.pipeline_mode<synchronous>, transform_indices = @transform_1, window_bounds = array<i64: 128, 128>}, {transform_indices = @transform_2, window_bounds = array<i64: 128, 128>}]} {
    %c0 = arith.constant 0 : index
    %c0_0 = arith.constant 0 : index
    %0 = vector.load %arg1[%c0, %c0_0] : memref<128x128xbf16, #tpu.memory_space<vmem>>, vector<128x128xbf16>
    %c0_1 = arith.constant 0 : index
    %c0_2 = arith.constant 0 : index
    %1 = vector.load %arg2[%c0_1, %c0_2] : memref<128x128xbf16, #tpu.memory_space<vmem>>, vector<128x128xbf16>
    %cst = arith.constant dense<0.000000e+00> : vector<128x128xf32>
    %2 = tpu.matmul %0, %1, %cst {dimension_numbers = #tpu.dot_dimension_numbers<[1], [0], [0], [1], [0, 0, 1, 1], [], []>} : vector<128x128xbf16>, vector<128x128xbf16>, vector<128x128xf32> -> vector<128x128xf32>
    %3 = arith.truncf %2 : vector<128x128xf32> to vector<128x128xbf16>
    %c0_3 = arith.constant 0 : index
    %c0_4 = arith.constant 0 : index
    %4 = vector.load %arg3[%c0_3, %c0_4] : memref<128x128xbf16, #tpu.memory_space<vmem>>, vector<128x128xbf16>
    tpu.vector_store %arg3[%c0_3, %c0_4], %3 {strides = array<i32>} : memref<128x128xbf16, #tpu.memory_space<vmem>>, vector<128x128xbf16>,
    return
  }
  func.func @transform_0(%arg0: i32) -> (i32, i32) {
    %c0_i32 = arith.constant 0 : i32
    %c0_i32_0 = arith.constant 0 : i32
    return %arg0, %c0_i32 : i32, i32
  }
  func.func @transform_1(%arg0: i32) -> (i32, i32) {
    %c0_i32 = arith.constant 0 : i32
    %c0_i32_0 = arith.constant 0 : i32
    %c0_i32_1 = arith.constant 0 : i32
    return %c0_i32, %c0_i32_0 : i32, i32
  }
  func.func @transform_2(%arg0: i32) -> (i32, i32) {
    %c0_i32 = arith.constant 0 : i32
    %c0_i32_0 = arith.constant 0 : i32
    return %arg0, %c0_i32 : i32, i32
  }
}

module attributes {stable_mosaic.version = 11 : i64} {
  func.func @_prop_resident_kernel(%arg0: i32, %arg1: memref<128x128xbf16, #tpu.memory_space<vmem>>, %arg2: memref<128x128xbf16, #tpu.memory_space<vmem>>, %arg3: memref<1x128xf32, #tpu.memory_space<vmem>>, %arg4: memref<128x128xbf16, #tpu.memory_space<vmem>>, %arg5: memref<128x128xbf16, #tpu.memory_space<vmem>>) attributes {dimension_semantics = [#tpu.dimension_semantics<parallel>], iteration_bounds = array<i64: 1>, scalar_prefetch = 0 : i64, scratch_operands = 0 : i64, tpu.core_type = #tpu.core_type<tc>, window_params = [{transform_indices = @transform_0, window_bounds = array<i64: 128, 128>}, {pipeline_mode = #tpu.pipeline_mode<synchronous>, transform_indices = @transform_1, window_bounds = array<i64: 128, 128>}, {pipeline_mode = #tpu.pipeline_mode<synchronous>, transform_indices = @transform_2, window_bounds = array<i64: 1, 128>}, {pipeline_mode = #tpu.pipeline_mode<synchronous>, transform_indices = @transform_3, window_bounds = array<i64: 128, 128>}, {transform_indices = @transform_4, window_bounds = array<i64: 128, 128>}]} {
    %c0 = arith.constant 0 : index
    %c0_0 = arith.constant 0 : index
    %0 = vector.load %arg1[%c0, %c0_0] : memref<128x128xbf16, #tpu.memory_space<vmem>>, vector<128x128xbf16>
    %c0_1 = arith.constant 0 : index
    %c0_2 = arith.constant 0 : index
    %1 = vector.load %arg2[%c0_1, %c0_2] : memref<128x128xbf16, #tpu.memory_space<vmem>>, vector<128x128xbf16>
    %cst = arith.constant dense<0.000000e+00> : vector<128x128xf32>
    %2 = tpu.matmul %0, %1, %cst {dimension_numbers = #tpu.dot_dimension_numbers<[1], [0], [0], [1], [0, 0, 1, 1], [], []>} : vector<128x128xbf16>, vector<128x128xbf16>, vector<128x128xf32> -> vector<128x128xf32>
    %c0_3 = arith.constant 0 : index
    %c0_4 = arith.constant 0 : index
    %3 = vector.load %arg3[%c0_3, %c0_4] : memref<1x128xf32, #tpu.memory_space<vmem>>, vector<1x128xf32>
    %4 = vector.broadcast %3 : vector<1x128xf32> to vector<128x128xf32>
    %5 = arith.addf %2, %4 : vector<128x128xf32>
    %cst_5 = arith.constant 0.000000e+00 : f32
    %6 = vector.broadcast %cst_5 : f32 to vector<128x128xf32>
    %7 = arith.maximumf %5, %6 : vector<128x128xf32>
    %8 = arith.truncf %7 : vector<128x128xf32> to vector<128x128xbf16>
    %c0_6 = arith.constant 0 : index
    %c0_7 = arith.constant 0 : index
    %9 = vector.load %arg4[%c0_6, %c0_7] : memref<128x128xbf16, #tpu.memory_space<vmem>>, vector<128x128xbf16>
    %cst_8 = arith.constant dense<0.000000e+00> : vector<128x128xf32>
    %10 = tpu.matmul %8, %9, %cst_8 {dimension_numbers = #tpu.dot_dimension_numbers<[1], [0], [0], [1], [0, 0, 1, 1], [], []>} : vector<128x128xbf16>, vector<128x128xbf16>, vector<128x128xf32> -> vector<128x128xf32>
    %11 = arith.truncf %10 : vector<128x128xf32> to vector<128x128xbf16>
    %c0_9 = arith.constant 0 : index
    %c0_10 = arith.constant 0 : index
    %12 = vector.load %arg5[%c0_9, %c0_10] : memref<128x128xbf16, #tpu.memory_space<vmem>>, vector<128x128xbf16>
    tpu.vector_store %arg5[%c0_9, %c0_10], %11 {strides = array<i32>} : memref<128x128xbf16, #tpu.memory_space<vmem>>, vector<128x128xbf16>,
    return
  }
  func.func @transform_0(%arg0: i32) -> (i32, i32) {
    %c0_i32 = arith.constant 0 : i32
    %c0_i32_0 = arith.constant 0 : i32
    return %arg0, %c0_i32 : i32, i32
  }
  func.func @transform_1(%arg0: i32) -> (i32, i32) {
    %c0_i32 = arith.constant 0 : i32
    %c0_i32_0 = arith.constant 0 : i32
    %c0_i32_1 = arith.constant 0 : i32
    return %c0_i32, %c0_i32_0 : i32, i32
  }
  func.func @transform_2(%arg0: i32) -> (i32, i32) {
    %c0_i32 = arith.constant 0 : i32
    %c0_i32_0 = arith.constant 0 : i32
    %c0_i32_1 = arith.constant 0 : i32
    return %c0_i32, %c0_i32_0 : i32, i32
  }
  func.func @transform_3(%arg0: i32) -> (i32, i32) {
    %c0_i32 = arith.constant 0 : i32
    %c0_i32_0 = arith.constant 0 : i32
    %c0_i32_1 = arith.constant 0 : i32
    return %c0_i32, %c0_i32_0 : i32, i32
  }
  func.func @transform_4(%arg0: i32) -> (i32, i32) {
    %c0_i32 = arith.constant 0 : i32
    %c0_i32_0 = arith.constant 0 : i32
    return %arg0, %c0_i32 : i32, i32
  }
}

module attributes {stable_mosaic.version = 11 : i64} {
  func.func @_prop_resident_kernel(%arg0: i32, %arg1: memref<128x128xbf16, #tpu.memory_space<vmem>>, %arg2: memref<128x128xbf16, #tpu.memory_space<vmem>>, %arg3: memref<1x128xf32, #tpu.memory_space<vmem>>, %arg4: memref<128x128xf32, #tpu.memory_space<vmem>>) attributes {dimension_semantics = [#tpu.dimension_semantics<parallel>], iteration_bounds = array<i64: 1>, scalar_prefetch = 0 : i64, scratch_operands = 0 : i64, tpu.core_type = #tpu.core_type<tc>, window_params = [{transform_indices = @transform_0, window_bounds = array<i64: 128, 128>}, {pipeline_mode = #tpu.pipeline_mode<synchronous>, transform_indices = @transform_1, window_bounds = array<i64: 128, 128>}, {pipeline_mode = #tpu.pipeline_mode<synchronous>, transform_indices = @transform_2, window_bounds = array<i64: 1, 128>}, {transform_indices = @transform_3, window_bounds = array<i64: 128, 128>}]} {
    %c0 = arith.constant 0 : index
    %c0_0 = arith.constant 0 : index
    %0 = vector.load %arg1[%c0, %c0_0] : memref<128x128xbf16, #tpu.memory_space<vmem>>, vector<128x128xbf16>
    %c0_1 = arith.constant 0 : index
    %c0_2 = arith.constant 0 : index
    %1 = vector.load %arg2[%c0_1, %c0_2] : memref<128x128xbf16, #tpu.memory_space<vmem>>, vector<128x128xbf16>
    %cst = arith.constant dense<0.000000e+00> : vector<128x128xf32>
    %2 = tpu.matmul %0, %1, %cst {dimension_numbers = #tpu.dot_dimension_numbers<[1], [0], [0], [1], [0, 0, 1, 1], [], []>} : vector<128x128xbf16>, vector<128x128xbf16>, vector<128x128xf32> -> vector<128x128xf32>
    %c0_3 = arith.constant 0 : index
    %c0_4 = arith.constant 0 : index
    %3 = vector.load %arg3[%c0_3, %c0_4] : memref<1x128xf32, #tpu.memory_space<vmem>>, vector<1x128xf32>
    %4 = vector.broadcast %3 : vector<1x128xf32> to vector<128x128xf32>
    %5 = arith.addf %2, %4 : vector<128x128xf32>
    %c0_5 = arith.constant 0 : index
    %c0_6 = arith.constant 0 : index
    %6 = vector.load %arg4[%c0_5, %c0_6] : memref<128x128xf32, #tpu.memory_space<vmem>>, vector<128x128xf32>
    tpu.vector_store %arg4[%c0_5, %c0_6], %5 {strides = array<i32>} : memref<128x128xf32, #tpu.memory_space<vmem>>, vector<128x128xf32>,
    return
  }
  func.func @transform_0(%arg0: i32) -> (i32, i32) {
    %c0_i32 = arith.constant 0 : i32
    %c0_i32_0 = arith.constant 0 : i32
    return %arg0, %c0_i32 : i32, i32
  }
  func.func @transform_1(%arg0: i32) -> (i32, i32) {
    %c0_i32 = arith.constant 0 : i32
    %c0_i32_0 = arith.constant 0 : i32
    %c0_i32_1 = arith.constant 0 : i32
    return %c0_i32, %c0_i32_0 : i32, i32
  }
  func.func @transform_2(%arg0: i32) -> (i32, i32) {
    %c0_i32 = arith.constant 0 : i32
    %c0_i32_0 = arith.constant 0 : i32
    %c0_i32_1 = arith.constant 0 : i32
    return %c0_i32, %c0_i32_0 : i32, i32
  }
  func.func @transform_3(%arg0: i32) -> (i32, i32) {
    %c0_i32 = arith.constant 0 : i32
    %c0_i32_0 = arith.constant 0 : i32
    return %arg0, %c0_i32 : i32, i32
  }
}

</mosaic_0001>

<bundles_post_ra>
// kernel: vgae_encoder_forward.3
= control target key start
LH: loop header
LB: loop body
LE: loop exit
PB: predicated region body
PF: predicated region fallthrough
CT: control target
= control target key end

     0   :  { %s583_s1 = inlined_call_operand.vmem [shape: bf16[128,128], index: 1, kind: input, shape index: {}]   ;;  %s584_s0 = inlined_call_operand.vmem [shape: bf16[128,128], index: 0, kind: input, shape index: {}]   ;;  %s585_s2 = inlined_call_operand.vmem [shape: bf16[128,128], index: 2, kind: output, shape index: {}]  }
   0x1   :  { %v480_v0 = vld [vmem:[%s583_s1 + $0x38] sm:$0xff]   ;;  %v481_v1 = vld [vmem:[%s583_s1 + $0x30] sm:$0xff]   ;;  %v482_v2 = vld [vmem:[%s583_s1 + $0x28] sm:$0xff]  }
   0x2   :  { %432 = vmatprep.subr.bf16.mxu0 %v480_v0  ;;  %464 = vmatprep.subr.bf16.mxu1 %v480_v0  ;;  %v483_v3 = vld [vmem:[%s583_s1 + $0x20] sm:$0xff]   ;;  %v484_v6 = vld [vmem:[%s583_s1 + $0x18] sm:$0xff]   ;;  %v485_v7 = vld [vmem:[%s583_s1 + $0x10] sm:$0xff]  }
   0x3   :  { %433 = vmatpush3.bf16.msra.mxu0 %v480_v0  ;;  %472 = vmatpush3.bf16.msra.mxu1 %v480_v0  ;;  %v488_v4 = vld [vmem:[%s584_s0] sm:$0xff]   ;;  %v486_v8 = vld [vmem:[%s583_s1 + $0x8] sm:$0xff]   ;;  %v492_v12 = vld [vmem:[%s584_s0 + $0x10] sm:$0xff]  }
   0x4   :  { %434 = vmatprep.subr.bf16.mxu0 %v481_v1  ;;  %465 = vmatprep.subr.bf16.mxu1 %v481_v1  ;;  %v489_v5 = vld [vmem:[%s584_s0 + $0x20] sm:$0xff]   ;;  %v490_v10 = vld [vmem:[%s584_s0 + $0x8] sm:$0xff]   ;;  %v493_v13 = vld [vmem:[%s584_s0 + $0x30] sm:$0xff]  }
   0x5   :  { %448 = vmatprep.mubr.bf16.mxu0 %v488_v4  ;;  %456 = vmatprep.mubr.bf16.mxu1 %v489_v5  ;;  %v487_v9 = vld [vmem:[%s583_s1] sm:$0xff]   ;;  %v491_v11 = vld [vmem:[%s584_s0 + $0x28] sm:$0xff]   ;;  %v494_v14 = vld [vmem:[%s584_s0 + $0x18] sm:$0xff]  }
   0x6   :  { %v495_v15 = vld [vmem:[%s584_s0 + $0x38] sm:$0xff]  }
   0x7   :  { %435 = vmatpush3.bf16.msra.mxu0 %v481_v1  ;;  %473 = vmatpush3.bf16.msra.mxu1 %v481_v1 }
   0x8   :  { %436 = vmatprep.subr.bf16.mxu0 %v482_v2  ;;  %466 = vmatprep.subr.bf16.mxu1 %v482_v2 }
   0xb   :  { %437 = vmatpush3.bf16.msra.mxu0 %v482_v2  ;;  %474 = vmatpush3.bf16.msra.mxu1 %v482_v2 }
   0xc   :  { %438 = vmatprep.subr.bf16.mxu0 %v483_v3  ;;  %467 = vmatprep.subr.bf16.mxu1 %v483_v3 }
   0xf   :  { %439 = vmatpush3.bf16.msra.mxu0 %v483_v3  ;;  %475 = vmatpush3.bf16.msra.mxu1 %v483_v3 }
  0x10   :  { %440 = vmatprep.subr.bf16.mxu0 %v484_v6  ;;  %468 = vmatprep.subr.bf16.mxu1 %v484_v6 }
  0x13   :  { %441 = vmatpush3.bf16.msra.mxu0 %v484_v6  ;;  %476 = vmatpush3.bf16.msra.mxu1 %v484_v6 }
  0x14   :  { %442 = vmatprep.subr.bf16.mxu0 %v485_v7  ;;  %469 = vmatprep.subr.bf16.mxu1 %v485_v7 }
  0x17   :  { %443 = vmatpush3.bf16.msra.mxu0 %v485_v7  ;;  %477 = vmatpush3.bf16.msra.mxu1 %v485_v7 }
  0x18   :  { %444 = vmatprep.subr.bf16.mxu0 %v486_v8  ;;  %470 = vmatprep.subr.bf16.mxu1 %v486_v8 }
  0x1b   :  { %445 = vmatpush3.bf16.msra.mxu0 %v486_v8  ;;  %478 = vmatpush3.bf16.msra.mxu1 %v486_v8 }
  0x1c   :  { %446 = vmatprep.subr.bf16.mxu0 %v487_v9  ;;  %471 = vmatprep.subr.bf16.mxu1 %v487_v9 }
  0x1f   :  { %447 = vmatpush3.bf16.msra.mxu0 %v487_v9  ;;  %479 = vmatpush3.bf16.msra.mxu1 %v487_v9 }
  0x22   :  { %449 = vmatmul.mubr.bf16.vlgmr.msra.gmra.mxu0 %v490_v10  ;;  %457 = vmatmul.mubr.bf16.vlgmr.msra.gmra.mxu1 %v491_v11 }
  0x23   :  { %452 = vmatprep.mubr.bf16.mxu0 %v492_v12  ;;  %460 = vmatprep.mubr.bf16.mxu1 %v493_v13 }
  0x2a   :  { %453 = vmatmul.mubr.bf16.gmra.mxu0 %v494_v14  ;;  %461 = vmatmul.mubr.bf16.gmra.mxu1 %v495_v15 }
  0xe2   :  { %v450_v16 = vpop.f32.mrf.mxu0  ;;  %v458_v17 = vpop.f32.mrf.mxu1 }
  0xe4   :  { %v174_v18 = vpop.f32.mrf.mxu0  ;;  %v206_v19 = vpop.f32.mrf.mxu1 }
  0xe6   :  { %v451_v20 = vpop.f32.mrf.mxu0  ;;  %v459_v21 = vpop.f32.mrf.mxu1 }
  0xe7   :  { %v377_v22 = vpack.c.bf16 %v451_v20, %v450_v16  ;;  %v397_v23 = vpack.c.bf16 %v459_v21, %v458_v17 }
  0xe8   :  { %v177_v24 = vpop.f32.mrf.mxu0  ;;  %v209_v25 = vpop.f32.mrf.mxu1 }
  0xe9   :  { %409 = vst [vmem:[%s585_s2 + $0x8] sm:$0xff] %v377_v22   ;;  %413 = vst [vmem:[%s585_s2 + $0x28] sm:$0xff] %v397_v23   ;;  %v372_v26 = vpack.c.bf16 %v177_v24, %v174_v18  ;;  %v392_v27 = vpack.c.bf16 %v209_v25, %v206_v19 }
  0xea   :  { %v454_v28 = vpop.f32.mrf.mxu0  ;;  %v462_v29 = vpop.f32.mrf.mxu1 }
  0xeb   :  { %373 = vst [vmem:[%s585_s2] sm:$0xff] %v372_v26   ;;  %412 = vst [vmem:[%s585_s2 + $0x20] sm:$0xff] %v392_v27  }
  0xec   :  { %v190_v30 = vpop.f32.mrf.mxu0  ;;  %v222_v31 = vpop.f32.mrf.mxu1 }
  0xee   :  { %v455_v32 = vpop.f32.mrf.mxu0  ;;  %v463_v33 = vpop.f32.mrf.mxu1 }
  0xef   :  { %v387_v34 = vpack.c.bf16 %v455_v32, %v454_v28  ;;  %v407_v35 = vpack.c.bf16 %v463_v33, %v462_v29 }
  0xf0   :  { %v193_v36 = vpop.f32.mrf.mxu0  ;;  %v225_v37 = vpop.f32.mrf.mxu1 }
  0xf1   :  { %411 = vst [vmem:[%s585_s2 + $0x18] sm:$0xff] %v387_v34   ;;  %415 = vst [vmem:[%s585_s2 + $0x38] sm:$0xff] %v407_v35   ;;  %v382_v38 = vpack.c.bf16 %v193_v36, %v190_v30  ;;  %v402_v39 = vpack.c.bf16 %v225_v37, %v222_v31 }
  0xf3   :  { %410 = vst [vmem:[%s585_s2 + $0x10] sm:$0xff] %v382_v38   ;;  %414 = vst [vmem:[%s585_s2 + $0x30] sm:$0xff] %v402_v39  }

// kernel: vgae_encoder_forward.5
= control target key start
LH: loop header
LB: loop body
LE: loop exit
PB: predicated region body
PF: predicated region fallthrough
CT: control target
= control target key end

     0   :  { %s483_s1 = inlined_call_operand.vmem [shape: bf16[128,128], index: 1, kind: input, shape index: {}]   ;;  %s484_s0 = inlined_call_operand.vmem [shape: bf16[128,128], index: 0, kind: input, shape index: {}]   ;;  %s485_s2 = inlined_call_operand.vmem [shape: f32[1,128], index: 2, kind: input, shape index: {}]   ;;  %s486_s3 = inlined_call_operand.vmem [shape: f32[128,128], index: 3, kind: output, shape index: {}]  }
   0x1   :  { %v348_v0 = vld [vmem:[%s483_s1 + $0x38] sm:$0xff]   ;;  %v349_v1 = vld [vmem:[%s483_s1 + $0x30] sm:$0xff]   ;;  %v350_v2 = vld [vmem:[%s483_s1 + $0x28] sm:$0xff]  }
   0x2   :  { %300 = vmatprep.subr.bf16.mxu0 %v348_v0  ;;  %332 = vmatprep.subr.bf16.mxu1 %v348_v0  ;;  %v351_v3 = vld [vmem:[%s483_s1 + $0x20] sm:$0xff]   ;;  %v352_v6 = vld [vmem:[%s483_s1 + $0x18] sm:$0xff]   ;;  %v353_v7 = vld [vmem:[%s483_s1 + $0x10] sm:$0xff]  }
   0x3   :  { %301 = vmatpush3.bf16.msra.mxu0 %v348_v0  ;;  %340 = vmatpush3.bf16.msra.mxu1 %v348_v0  ;;  %v356_v4 = vld [vmem:[%s484_s0] sm:$0xff]   ;;  %v354_v8 = vld [vmem:[%s483_s1 + $0x8] sm:$0xff]   ;;  %v360_v12 = vld [vmem:[%s484_s0 + $0x10] sm:$0xff]  }
   0x4   :  { %302 = vmatprep.subr.bf16.mxu0 %v349_v1  ;;  %333 = vmatprep.subr.bf16.mxu1 %v349_v1  ;;  %v357_v5 = vld [vmem:[%s484_s0 + $0x20] sm:$0xff]   ;;  %v358_v10 = vld [vmem:[%s484_s0 + $0x8] sm:$0xff]   ;;  %v361_v13 = vld [vmem:[%s484_s0 + $0x30] sm:$0xff]  }
   0x5   :  { %316 = vmatprep.mubr.bf16.mxu0 %v356_v4  ;;  %324 = vmatprep.mubr.bf16.mxu1 %v357_v5  ;;  %v355_v9 = vld [vmem:[%s483_s1] sm:$0xff]   ;;  %v359_v11 = vld [vmem:[%s484_s0 + $0x28] sm:$0xff]   ;;  %v362_v14 = vld [vmem:[%s484_s0 + $0x18] sm:$0xff]  }
   0x6   :  { %v363_v15 = vld [vmem:[%s484_s0 + $0x38] sm:$0xff]   ;;  %v267_v16 = vld [vmem:[%s485_s2] ss:$0 sm:$0xff] }
   0x7   :  { %303 = vmatpush3.bf16.msra.mxu0 %v349_v1  ;;  %341 = vmatpush3.bf16.msra.mxu1 %v349_v1 }
   0x8   :  { %304 = vmatprep.subr.bf16.mxu0 %v350_v2  ;;  %334 = vmatprep.subr.bf16.mxu1 %v350_v2 }
   0xb   :  { %305 = vmatpush3.bf16.msra.mxu0 %v350_v2  ;;  %342 = vmatpush3.bf16.msra.mxu1 %v350_v2 }
   0xc   :  { %306 = vmatprep.subr.bf16.mxu0 %v351_v3  ;;  %335 = vmatprep.subr.bf16.mxu1 %v351_v3 }
   0xf   :  { %307 = vmatpush3.bf16.msra.mxu0 %v351_v3  ;;  %343 = vmatpush3.bf16.msra.mxu1 %v351_v3 }
  0x10   :  { %308 = vmatprep.subr.bf16.mxu0 %v352_v6  ;;  %336 = vmatprep.subr.bf16.mxu1 %v352_v6 }
  0x13   :  { %309 = vmatpush3.bf16.msra.mxu0 %v352_v6  ;;  %344 = vmatpush3.bf16.msra.mxu1 %v352_v6 }
  0x14   :  { %310 = vmatprep.subr.bf16.mxu0 %v353_v7  ;;  %337 = vmatprep.subr.bf16.mxu1 %v353_v7 }
  0x17   :  { %311 = vmatpush3.bf16.msra.mxu0 %v353_v7  ;;  %345 = vmatpush3.bf16.msra.mxu1 %v353_v7 }
  0x18   :  { %312 = vmatprep.subr.bf16.mxu0 %v354_v8  ;;  %338 = vmatprep.subr.bf16.mxu1 %v354_v8 }
  0x1b   :  { %313 = vmatpush3.bf16.msra.mxu0 %v354_v8  ;;  %346 = vmatpush3.bf16.msra.mxu1 %v354_v8 }
  0x1c   :  { %314 = vmatprep.subr.bf16.mxu0 %v355_v9  ;;  %339 = vmatprep.subr.bf16.mxu1 %v355_v9 }
  0x1f   :  { %315 = vmatpush3.bf16.msra.mxu0 %v355_v9  ;;  %347 = vmatpush3.bf16.msra.mxu1 %v355_v9 }
  0x22   :  { %317 = vmatmul.mubr.bf16.vlgmr.msra.gmra.mxu0 %v358_v10  ;;  %325 = vmatmul.mubr.bf16.vlgmr.msra.gmra.mxu1 %v359_v11 }
  0x23   :  { %320 = vmatprep.mubr.bf16.mxu0 %v360_v12  ;;  %328 = vmatprep.mubr.bf16.mxu1 %v361_v13 }
  0x2a   :  { %321 = vmatmul.mubr.bf16.gmra.mxu0 %v362_v14  ;;  %329 = vmatmul.mubr.bf16.gmra.mxu1 %v363_v15 }
  0xe2   :  { %v318_v17 = vpop.f32.mrf.mxu0  ;;  %v326_v18 = vpop.f32.mrf.mxu1 }
  0xe3   :  { %v193_v19 = vadd.f32 %v318_v17, %v267_v16  ;;  %v225_v20 = vadd.f32 %v326_v18, %v267_v16 }
  0xe4   :  { %v184_v21 = vpop.f32.mrf.mxu0  ;;  %v216_v22 = vpop.f32.mrf.mxu1 }
  0xe5   :  { %249 = vst [vmem:[%s486_s3 + $0x10] sm:$0xff] %v193_v19  ;;  %257 = vst [vmem:[%s486_s3 + $0x50] sm:$0xff] %v225_v20  ;;  %v185_v23 = vadd.f32 %v267_v16, %v184_v21  ;;  %v217_v24 = vadd.f32 %v267_v16, %v216_v22 }
  0xe6   :  { %v319_v25 = vpop.f32.mrf.mxu0  ;;  %v327_v26 = vpop.f32.mrf.mxu1 }
  0xe7   :  { %247 = vst [vmem:[%s486_s3] sm:$0xff] %v185_v23  ;;  %255 = vst [vmem:[%s486_s3 + $0x40] sm:$0xff] %v217_v24  ;;  %v196_v27 = vadd.f32 %v319_v25, %v267_v16  ;;  %v228_v28 = vadd.f32 %v327_v26, %v267_v16 }
  0xe8   :  { %v187_v29 = vpop.f32.mrf.mxu0  ;;  %v219_v30 = vpop.f32.mrf.mxu1 }
  0xe9   :  { %250 = vst [vmem:[%s486_s3 + $0x18] sm:$0xff] %v196_v27  ;;  %258 = vst [vmem:[%s486_s3 + $0x58] sm:$0xff] %v228_v28  ;;  %v188_v31 = vadd.f32 %v267_v16, %v187_v29  ;;  %v220_v32 = vadd.f32 %v267_v16, %v219_v30 }
  0xea   :  { %v322_v33 = vpop.f32.mrf.mxu0  ;;  %v330_v34 = vpop.f32.mrf.mxu1 }
  0xeb   :  { %248 = vst [vmem:[%s486_s3 + $0x8] sm:$0xff] %v188_v31  ;;  %256 = vst [vmem:[%s486_s3 + $0x48] sm:$0xff] %v220_v32  ;;  %v209_v35 = vadd.f32 %v322_v33, %v267_v16  ;;  %v241_v36 = vadd.f32 %v330_v34, %v267_v16 }
  0xec   :  { %v200_v37 = vpop.f32.mrf.mxu0  ;;  %v232_v38 = vpop.f32.mrf.mxu1 }
  0xed   :  { %253 = vst [vmem:[%s486_s3 + $0x30] sm:$0xff] %v209_v35  ;;  %261 = vst [vmem:[%s486_s3 + $0x70] sm:$0xff] %v241_v36  ;;  %v201_v39 = vadd.f32 %v267_v16, %v200_v37  ;;  %v233_v40 = vadd.f32 %v267_v16, %v232_v38 }
  0xee   :  { %v323_v41 = vpop.f32.mrf.mxu0  ;;  %v331_v42 = vpop.f32.mrf.mxu1 }
  0xef   :  { %251 = vst [vmem:[%s486_s3 + $0x20] sm:$0xff] %v201_v39  ;;  %259 = vst [vmem:[%s486_s3 + $0x60] sm:$0xff] %v233_v40  ;;  %v212_v43 = vadd.f32 %v323_v41, %v267_v16  ;;  %v244_v44 = vadd.f32 %v331_v42, %v267_v16 }
  0xf0   :  { %v203_v45 = vpop.f32.mrf.mxu0  ;;  %v235_v46 = vpop.f32.mrf.mxu1 }
  0xf1   :  { %254 = vst [vmem:[%s486_s3 + $0x38] sm:$0xff] %v212_v43  ;;  %262 = vst [vmem:[%s486_s3 + $0x78] sm:$0xff] %v244_v44  ;;  %v204_v47 = vadd.f32 %v267_v16, %v203_v45  ;;  %v236_v48 = vadd.f32 %v267_v16, %v235_v46 }
  0xf3   :  { %252 = vst [vmem:[%s486_s3 + $0x28] sm:$0xff] %v204_v47  ;;  %260 = vst [vmem:[%s486_s3 + $0x68] sm:$0xff] %v236_v48 }

// kernel: vgae_encoder_forward.4
= control target key start
LH: loop header
LB: loop body
LE: loop exit
PB: predicated region body
PF: predicated region fallthrough
CT: control target
= control target key end

     0   :  { %s867_s1 = inlined_call_operand.vmem [shape: bf16[128,128], index: 1, kind: input, shape index: {}]   ;;  %s868_s0 = inlined_call_operand.vmem [shape: bf16[128,128], index: 0, kind: input, shape index: {}]   ;;  %s869_s3 = inlined_call_operand.vmem [shape: bf16[128,128], index: 3, kind: input, shape index: {}]   ;;  %s870_s2 = inlined_call_operand.vmem [shape: f32[1,128], index: 2, kind: input, shape index: {}]   ;;  %s871_s4 = inlined_call_operand.vmem [shape: bf16[128,128], index: 4, kind: output, shape index: {}]  }
   0x1   :  { %v719_v0 = vld [vmem:[%s867_s1 + $0x38] sm:$0xff]   ;;  %v720_v1 = vld [vmem:[%s867_s1 + $0x30] sm:$0xff]   ;;  %v721_v2 = vld [vmem:[%s867_s1 + $0x28] sm:$0xff]  }
   0x2   :  { %655 = vmatprep.subr.bf16.mxu0 %v719_v0  ;;  %v722_v3 = vld [vmem:[%s867_s1 + $0x20] sm:$0xff]   ;;  %v723_v5 = vld [vmem:[%s867_s1 + $0x18] sm:$0xff]   ;;  %v724_v6 = vld [vmem:[%s867_s1 + $0x10] sm:$0xff]  }
   0x3   :  { %656 = vmatpush3.bf16.msra.mxu0 %v719_v0  ;;  %v727_v4 = vld [vmem:[%s868_s0] sm:$0xff]   ;;  %v735_v7 = vld [vmem:[%s869_s3 + $0x38] sm:$0xff]   ;;  %v736_v8 = vld [vmem:[%s869_s3 + $0x30] sm:$0xff]  }
   0x4   :  { %657 = vmatprep.subr.bf16.mxu0 %v720_v1  ;;  %671 = vmatprep.mubr.bf16.mxu0 %v727_v4  ;;  %v725_v9 = vld [vmem:[%s867_s1 + $0x8] sm:$0xff]   ;;  %v726_v11 = vld [vmem:[%s867_s1] sm:$0xff]   ;;  %v739_v13 = vld [vmem:[%s869_s3 + $0x18] sm:$0xff]  }
   0x5   :  { %687 = vmatprep.subr.bf16.mxu1 %v735_v7  ;;  %v737_v10 = vld [vmem:[%s869_s3 + $0x28] sm:$0xff]   ;;  %v738_v12 = vld [vmem:[%s869_s3 + $0x20] sm:$0xff]   ;;  %v729_v15 = vld [vmem:[%s868_s0 + $0x10] sm:$0xff]  }
   0x6   :  { %688 = vmatpush3.bf16.msra.mxu1 %v735_v7  ;;  %v728_v14 = vld [vmem:[%s868_s0 + $0x8] sm:$0xff]   ;;  %v730_v16 = vld [vmem:[%s868_s0 + $0x18] sm:$0xff]   ;;  %v731_v17 = vld [vmem:[%s868_s0 + $0x20] sm:$0xff]  }
   0x7   :  { %658 = vmatpush3.bf16.msra.mxu0 %v720_v1  ;;  %689 = vmatprep.subr.bf16.mxu1 %v736_v8  ;;  %v732_v18 = vld [vmem:[%s868_s0 + $0x28] sm:$0xff]   ;;  %v733_v19 = vld [vmem:[%s868_s0 + $0x30] sm:$0xff]   ;;  %v734_v20 = vld [vmem:[%s868_s0 + $0x38] sm:$0xff]  }
   0x8   :  { %659 = vmatprep.subr.bf16.mxu0 %v721_v2  ;;  %v740_v21 = vld [vmem:[%s869_s3 + $0x10] sm:$0xff]   ;;  %v741_v22 = vld [vmem:[%s869_s3 + $0x8] sm:$0xff]   ;;  %v742_v23 = vld [vmem:[%s869_s3] sm:$0xff]  }
   0x9   :  { %v519_v26 = vld [vmem:[%s870_s2] ss:$0 sm:$0xff] }
   0xa   :  { %690 = vmatpush3.bf16.msra.mxu1 %v736_v8 }
   0xb   :  { %660 = vmatpush3.bf16.msra.mxu0 %v721_v2  ;;  %691 = vmatprep.subr.bf16.mxu1 %v737_v10 }
   0xc   :  { %661 = vmatprep.subr.bf16.mxu0 %v722_v3 }
   0xe   :  { %692 = vmatpush3.bf16.msra.mxu1 %v737_v10 }
   0xf   :  { %662 = vmatpush3.bf16.msra.mxu0 %v722_v3  ;;  %693 = vmatprep.subr.bf16.mxu1 %v738_v12 }
  0x10   :  { %663 = vmatprep.subr.bf16.mxu0 %v723_v5 }
  0x12   :  { %694 = vmatpush3.bf16.msra.mxu1 %v738_v12 }
  0x13   :  { %664 = vmatpush3.bf16.msra.mxu0 %v723_v5  ;;  %695 = vmatprep.subr.bf16.mxu1 %v739_v13 }
  0x14   :  { %665 = vmatprep.subr.bf16.mxu0 %v724_v6 }
  0x16   :  { %696 = vmatpush3.bf16.msra.mxu1 %v739_v13 }
  0x17   :  { %666 = vmatpush3.bf16.msra.mxu0 %v724_v6  ;;  %697 = vmatprep.subr.bf16.mxu1 %v740_v21 }
  0x18   :  { %667 = vmatprep.subr.bf16.mxu0 %v725_v9 }
  0x1a   :  { %698 = vmatpush3.bf16.msra.mxu1 %v740_v21 }
  0x1b   :  { %668 = vmatpush3.bf16.msra.mxu0 %v725_v9  ;;  %699 = vmatprep.subr.bf16.mxu1 %v741_v22 }
  0x1c   :  { %669 = vmatprep.subr.bf16.mxu0 %v726_v11 }
  0x1e   :  { %700 = vmatpush3.bf16.msra.mxu1 %v741_v22 }
  0x1f   :  { %670 = vmatpush3.bf16.msra.mxu0 %v726_v11  ;;  %701 = vmatprep.subr.bf16.mxu1 %v742_v23 }
  0x22   :  { %672 = vmatmul.mubr.bf16.vlgmr.msra.gmra.mxu0 %v728_v14  ;;  %702 = vmatpush3.bf16.msra.mxu1 %v742_v23 }
  0x23   :  { %675 = vmatprep.mubr.bf16.mxu0 %v729_v15 }
  0x2a   :  { %676 = vmatmul.mubr.bf16.gmra.mxu0 %v730_v16 }
  0x2b   :  { %679 = vmatprep.mubr.bf16.mxu0 %v731_v17 }
  0x32   :  { %680 = vmatmul.mubr.bf16.gmra.mxu0 %v732_v18 }
  0x33   :  { %683 = vmatprep.mubr.bf16.mxu0 %v733_v19 }
  0x3a   :  { %684 = vmatmul.mubr.bf16.gmra.mxu0 %v734_v20 }
  0xe2   :  { %v673_v24 = vpop.f32.mrf.mxu0 }
  0xe3   :  { %v196_v30 = vadd.f32 %v673_v24, %v519_v26 }
  0xe4   :  { %v187_v25 = vpop.f32.mrf.mxu0 }
  0xe5   :  { %v188_v28 = vadd.f32 %v519_v26, %v187_v25  ;;  %v252_v37 = vmax.f32 %v196_v30, 0.0 }
  0xe6   :  { %v674_v27 = vpop.f32.mrf.mxu0 }
  0xe7   :  { %v199_v29 = vadd.f32 %v674_v27, %v519_v26  ;;  %v250_v35 = vmax.f32 %v188_v28, 0.0 }
  0xe8   :  { %v190_v31 = vpop.f32.mrf.mxu0 }
  0xe9   :  { %v191_v32 = vadd.f32 %v519_v26, %v190_v31  ;;  %v253_v33 = vmax.f32 %v199_v29, 0.0 }
  0xea   :  { %v677_v34 = vpop.f32.mrf.mxu0 }
  0xeb   :  { %v251_v36 = vmax.f32 %v191_v32, 0.0  ;;  %v267_v40 = vpack.c.bf16 %v253_v33, %v252_v37  ;;  %v212_v44 = vadd.f32 %v677_v34, %v519_v26 }
  0xec   :  { %v203_v38 = vpop.f32.mrf.mxu0 }
  0xed   :  { %v266_v39 = vpack.c.bf16 %v251_v36, %v250_v35  ;;  %v204_v42 = vadd.f32 %v519_v26, %v203_v38  ;;  %v256_v51 = vmax.f32 %v212_v44, 0.0 }
  0xee   :  { %v678_v41 = vpop.f32.mrf.mxu0 }
  0xef   :  { %v215_v43 = vadd.f32 %v678_v41, %v519_v26  ;;  %703 = vmatprep.mubr.bf16.mxu1 %v266_v39  ;;  %v254_v49 = vmax.f32 %v204_v42, 0.0 }
  0xf0   :  { %v206_v45 = vpop.f32.mrf.mxu0  ;;  %704 = vmatmul.mubr.bf16.vlgmr.msra.gmra.mxu1 %v267_v40 }
  0xf1   :  { %v207_v46 = vadd.f32 %v519_v26, %v206_v45  ;;  %v257_v47 = vmax.f32 %v215_v43, 0.0 }
  0xf2   :  { %v681_v48 = vpop.f32.mrf.mxu0 }
  0xf3   :  { %v255_v50 = vmax.f32 %v207_v46, 0.0  ;;  %v269_v54 = vpack.c.bf16 %v257_v47, %v256_v51  ;;  %v228_v58 = vadd.f32 %v681_v48, %v519_v26 }
  0xf4   :  { %v219_v52 = vpop.f32.mrf.mxu0 }
  0xf5   :  { %v268_v53 = vpack.c.bf16 %v255_v50, %v254_v49  ;;  %v220_v56 = vadd.f32 %v519_v26, %v219_v52  ;;  %v260_v1 = vmax.f32 %v228_v58, 0.0 }
  0xf6   :  { %v682_v55 = vpop.f32.mrf.mxu0 }
  0xf7   :  { %v231_v57 = vadd.f32 %v682_v55, %v519_v26  ;;  %707 = vmatprep.mubr.bf16.mxu1 %v268_v53  ;;  %v258_v63 = vmax.f32 %v220_v56, 0.0 }
  0xf8   :  { %v222_v59 = vpop.f32.mrf.mxu0  ;;  %708 = vmatmul.mubr.bf16.gmra.mxu1 %v269_v54 }
  0xf9   :  { %v223_v60 = vadd.f32 %v519_v26, %v222_v59  ;;  %v261_v61 = vmax.f32 %v231_v57, 0.0 }
  0xfa   :  { %v685_v62 = vpop.f32.mrf.mxu0 }
  0xfb   :  { %v259_v0 = vmax.f32 %v223_v60, 0.0  ;;  %v271_v4 = vpack.c.bf16 %v261_v61, %v260_v1  ;;  %v244_v8 = vadd.f32 %v685_v62, %v519_v26 }
  0xfc   :  { %v235_v2 = vpop.f32.mrf.mxu0 }
  0xfd   :  { %v270_v3 = vpack.c.bf16 %v259_v0, %v258_v63  ;;  %v236_v6 = vadd.f32 %v519_v26, %v235_v2  ;;  %v264_v14 = vmax.f32 %v244_v8, 0.0 }
  0xfe   :  { %v686_v5 = vpop.f32.mrf.mxu0 }
  0xff   :  { %v247_v7 = vadd.f32 %v686_v5, %v519_v26  ;;  %711 = vmatprep.mubr.bf16.mxu1 %v270_v3  ;;  %v262_v12 = vmax.f32 %v236_v6, 0.0 }
 0x100   :  { %v238_v9 = vpop.f32.mrf.mxu0  ;;  %712 = vmatmul.mubr.bf16.gmra.mxu1 %v271_v4 }
 0x101   :  { %v239_v10 = vadd.f32 %v519_v26, %v238_v9  ;;  %v265_v11 = vmax.f32 %v247_v7, 0.0 }
 0x103   :  { %v263_v13 = vmax.f32 %v239_v10, 0.0  ;;  %v273_v16 = vpack.c.bf16 %v265_v11, %v264_v14 }
 0x105   :  { %v272_v15 = vpack.c.bf16 %v263_v13, %v262_v12 }
 0x107   :  { %715 = vmatprep.mubr.bf16.mxu1 %v272_v15 }
 0x108   :  { %716 = vmatmul.mubr.bf16.gmra.mxu1 %v273_v16 }
 0x1b0   :  { %v705_v17 = vpop.f32.mrf.mxu1 }
 0x1b2   :  { %v372_v18 = vpop.f32.mrf.mxu1 }
 0x1b4   :  { %v706_v19 = vpop.f32.mrf.mxu1 }
 0x1b5   :  { %v584_v20 = vpack.c.bf16 %v706_v19, %v705_v17 }
 0x1b6   :  { %v375_v21 = vpop.f32.mrf.mxu1 }
 0x1b7   :  { %616 = vst [vmem:[%s871_s4 + $0x8] sm:$0xff] %v584_v20   ;;  %v579_v22 = vpack.c.bf16 %v375_v21, %v372_v18 }
 0x1b8   :  { %v709_v23 = vpop.f32.mrf.mxu1 }
 0x1b9   :  { %580 = vst [vmem:[%s871_s4] sm:$0xff] %v579_v22  }
 0x1ba   :  { %v388_v24 = vpop.f32.mrf.mxu1 }
 0x1bc   :  { %v710_v25 = vpop.f32.mrf.mxu1 }
 0x1bd   :  { %v594_v26 = vpack.c.bf16 %v710_v25, %v709_v23 }
 0x1be   :  { %v391_v27 = vpop.f32.mrf.mxu1 }
 0x1bf   :  { %618 = vst [vmem:[%s871_s4 + $0x18] sm:$0xff] %v594_v26   ;;  %v589_v28 = vpack.c.bf16 %v391_v27, %v388_v24 }
 0x1c0   :  { %v713_v29 = vpop.f32.mrf.mxu1 }
 0x1c1   :  { %617 = vst [vmem:[%s871_s4 + $0x10] sm:$0xff] %v589_v28  }
 0x1c2   :  { %v404_v30 = vpop.f32.mrf.mxu1 }
 0x1c4   :  { %v714_v31 = vpop.f32.mrf.mxu1 }
 0x1c5   :  { %v604_v32 = vpack.c.bf16 %v714_v31, %v713_v29 }
 0x1c6   :  { %v407_v33 = vpop.f32.mrf.mxu1 }
 0x1c7   :  { %620 = vst [vmem:[%s871_s4 + $0x28] sm:$0xff] %v604_v32   ;;  %v599_v34 = vpack.c.bf16 %v407_v33, %v404_v30 }
 0x1c8   :  { %v717_v35 = vpop.f32.mrf.mxu1 }
 0x1c9   :  { %619 = vst [vmem:[%s871_s4 + $0x20] sm:$0xff] %v599_v34  }
 0x1ca   :  { %v420_v36 = vpop.f32.mrf.mxu1 }
 0x1cc   :  { %v718_v37 = vpop.f32.mrf.mxu1 }
 0x1cd   :  { %v614_v38 = vpack.c.bf16 %v718_v37, %v717_v35 }
 0x1ce   :  { %v423_v39 = vpop.f32.mrf.mxu1 }
 0x1cf   :  { %622 = vst [vmem:[%s871_s4 + $0x38] sm:$0xff] %v614_v38   ;;  %v609_v40 = vpack.c.bf16 %v423_v39, %v420_v36 }
 0x1d1   :  { %621 = vst [vmem:[%s871_s4 + $0x30] sm:$0xff] %v609_v40  }

</bundles_post_ra>
